<compile_context>
chip_gen: v5e
topology: v5e:2x2
jax: 0.10.0
libtpu: 0.0.40
codegen_flags: <defaults>
</compile_context>

<pallas_src>
import functools
import numpy as np
import jax
import jax.numpy as jnp
from jax.experimental import pallas as pl
from jax.experimental.pallas import tpu as pltpu

# ----- static FSQ configuration (matches nn.Module __init__ defaults) -------
LEVELS = [5, 5, 5, 8, 8]
EPS = 1e-3
D = len(LEVELS)
PACK = 128                 # FSQ vectors packed per lane-dense row
W = D * PACK               # 640 lanes per packed row

_levels_f = np.asarray(LEVELS, dtype=np.float32)
_HALF_L = ((_levels_f - 1.0) * (1.0 - EPS) / 2.0).astype(np.float32)          # (D,)
_OFFSET = np.where(np.asarray(LEVELS) % 2 == 1, 0.0, 0.5).astype(np.float32)  # (D,)
# NOTE: module literally uses torch.tan(offset / half_l); we match it exactly.
_SHIFT = np.tan(_OFFSET / _HALF_L).astype(np.float32)                         # (D,)
_HALF_WIDTH = (np.asarray(LEVELS, dtype=np.int64) // 2).astype(np.float32)    # (D,)
_INV_HALF_WIDTH = (1.0 / _HALF_WIDTH).astype(np.float32)                      # (D,)
_basis = [1]
for i in range(D - 1):
    _basis.append(_basis[-1] * LEVELS[i])
_BASIS = np.asarray(_basis, dtype=np.float32)                                 # (D,)
CODEBOOK_SIZE = int(np.prod(LEVELS))

# Merged lane-dense constants (8, 640): rows = shift, half_l, offset, 1/half_width.
_CONSTS = np.zeros((8, W), dtype=np.float32)
_CONSTS[0] = np.tile(_SHIFT, PACK)
_CONSTS[1] = np.tile(_HALF_L, PACK)
_CONSTS[2] = np.tile(_OFFSET, PACK)
_CONSTS[3] = np.tile(_INV_HALF_WIDTH, PACK)

# Exact bf16 hi/lo split of the basis (625 is not bf16-representable).
_BASIS_HI = _BASIS.astype(jnp.bfloat16).astype(np.float32)      # bf16-exact
_BASIS_LO = (_BASIS - _BASIS_HI).astype(np.float32)             # residual ({0,...,1})
assert np.all(_BASIS_HI.astype(jnp.bfloat16).astype(np.float32) == _BASIS_HI)
assert np.all(_BASIS_LO.astype(jnp.bfloat16).astype(np.float32) == _BASIS_LO)
assert np.all(_BASIS_HI + _BASIS_LO == _BASIS)

# Block-diagonal basis matrix, hi columns [0:128], lo columns [128:256], bf16.
# idx_j = sum_d rounded[5j + d] * basis[d] + IDX_OFFSET
_BMAT = np.zeros((W, 2 * PACK), dtype=np.float32)
for _j in range(PACK):
    _BMAT[D * _j:D * _j + D, _j] = _BASIS_HI
    _BMAT[D * _j:D * _j + D, PACK + _j] = _BASIS_LO
_BMAT_BF16 = _BMAT.astype(jnp.bfloat16)                          # (640, 256)

# scaled = rounded + half_width  =>  constant part of the index reduction:
_IDX_OFFSET = float(np.dot(_HALF_WIDTH, _BASIS))                 # = 3062.0


# ----- Pallas kernel ---------------------------------------------------------
def _fsq_kernel(z_ref, consts_ref, bmat_ref, q_ref, idx_ref):
    # z_ref:     (bn, 640) f32/bf16 -- 128 FSQ vectors per row, lane-dense
    # consts_ref:(8, 640)  f32      -- rows: shift, half_l, offset, 1/half_width
    # bmat_ref:  (640, 256) bf16    -- block-diagonal basis, hi|lo halves
    # q_ref:     (bn, 640) input-dtype
    # idx_ref:   (bn, 128) i32
    z = z_ref[...].astype(jnp.float32)
    shift = consts_ref[0:1, :]
    half_l = consts_ref[1:2, :]
    offset = consts_ref[2:3, :]
    inv_hw = consts_ref[3:4, :]

    # bound(): tanh(z + shift) * half_l - offset    (tanh -> EUP slot)
    bounded = jnp.tanh(z + shift) * half_l - offset
    # round_ste() forward semantics: round-half-to-even (same as torch.round)
    rounded = jnp.round(bounded)
    # quantize(): divide by half_width == multiply by exact power-of-two reciprocal
    q_ref[...] = (rounded * inv_hw).astype(q_ref.dtype)

    # codes_to_indexes(): one bf16 MXU matmul against the block-diagonal hi/lo
    # basis matrix. `rounded` holds small integers (|x| <= 4) -> exact in bf16;
    # hi/lo split keeps the 625 coefficient exact; accumulation is f32.
    r16 = rounded.astype(jnp.bfloat16)
    prod = jnp.dot(r16, bmat_ref[...], preferred_element_type=jnp.float32)  # (bn, 256)
    idx_f = prod[:, :PACK] + prod[:, PACK:] + _IDX_OFFSET
    # values are exact non-negative integers; +0.5 makes the truncating cast robust
    idx_ref[...] = (idx_f + 0.5).astype(jnp.int32)


# ----- wrapper ---------------------------------------------------------------
@functools.partial(jax.jit, static_argnames=("block_rows",))
def fsq_forward(z, block_rows=2048):
    """FSQ forward. z: (..., 5) float -> (quantized (..., 5), indices (...) i32)."""
    assert z.shape[-1] == D, f"last dim must be {D}"
    lead = z.shape[:-1]
    N = int(np.prod(lead)) if lead else 1

    # Keep the caller's activation dtype (f32 / bf16); upcast inside the kernel.
    if z.dtype not in (jnp.float32, jnp.bfloat16):
        z = z.astype(jnp.float32)

    zf = z.reshape(N, D)
    # Pack 128 FSQ vectors per row (pure row-major reshape). Only pad up to the
    # next multiple of 128 vectors; the ragged grid tail is handled by Pallas.
    rows = -(-N // PACK)                       # ceil(N / 128)
    pad_n = rows * PACK - N
    if pad_n:
        zf = jnp.pad(zf, ((0, pad_n), (0, 0)))
    zp = zf.reshape(rows, W)                   # (rows, 640)

    # Block size: multiple of 8 rows, capped by block_rows, and chosen so the
    # grid has >= 2 steps whenever possible (megacore / v7x 2-TC sharding).
    if rows <= 8:
        bn = rows                              # full-array block (allowed)
    else:
        target = min(block_rows, (rows + 1) // 2)
        bn = max(8, ((target + 7) // 8) * 8)
    grid = (pl.cdiv(rows, bn),)

    itemsize = jnp.dtype(zp.dtype).itemsize
    cost = pl.CostEstimate(
        flops=2 * rows * W * (2 * PACK) + 8 * rows * W,
        transcendentals=rows * W,
        bytes_accessed=(rows * W * itemsize          # z in
                        + rows * W * itemsize        # quantized out
                        + rows * PACK * 4            # indices out
                        + _CONSTS.nbytes + _BMAT_BF16.nbytes),
    )

    q_p, idx_p = pl.pallas_call(
        _fsq_kernel,
        out_shape=(
            jax.ShapeDtypeStruct((rows, W), zp.dtype),
            jax.ShapeDtypeStruct((rows, PACK), jnp.int32),
        ),
        grid=grid,
        in_specs=[
            pl.BlockSpec((bn, W), lambda i: (i, 0)),           # packed z
            pl.BlockSpec((8, W), lambda i: (0, 0)),            # merged constants
            pl.BlockSpec((W, 2 * PACK), lambda i: (0, 0)),     # hi/lo basis matrix
        ],
        out_specs=(
            pl.BlockSpec((bn, W), lambda i: (i, 0)),           # quantized
            pl.BlockSpec((bn, PACK), lambda i: (i, 0)),        # indices (lane-dense)
        ),
        compiler_params=pltpu.CompilerParams(dimension_semantics=("parallel",)),
        cost_estimate=cost,
    )(zp, jnp.asarray(_CONSTS), jnp.asarray(_BMAT_BF16))

    q = q_p.reshape(rows * PACK, D)[:N].reshape(*lead, D)
    idx = idx_p.reshape(rows * PACK)[:N].reshape(lead)
    return q, idx


# ----- pure-JAX reference (for sanity check only) ----------------------------
def _fsq_reference(z):
    half_l = jnp.asarray(_HALF_L)
    offset = jnp.asarray(_OFFSET)
    shift = jnp.asarray(_SHIFT)
    half_width = jnp.asarray(_HALF_WIDTH)
    basis = jnp.asarray(_BASIS)
    bounded = jnp.tanh(z.astype(jnp.float32) + shift) * half_l - offset
    q = jnp.round(bounded) / half_width
    scaled = q * half_width + half_width
    idx = jnp.sum(scaled * basis, axis=-1).astype(jnp.int32)
    return q, idx


if __name__ == "__main__":
    key = jax.random.PRNGKey(0)

    # Small deterministic example: (2, 16, 16, 5) -> N = 512 (multiple of 128).
    z = jax.random.normal(key, (2, 16, 16, D), dtype=jnp.float32) * 2.0
    q, idx = fsq_forward(z)
    jax.block_until_ready((q, idx))

    q_ref, idx_ref = _fsq_reference(z)
    np.testing.assert_allclose(np.asarray(q), np.asarray(q_ref), rtol=1e-5, atol=1e-5)
    np.testing.assert_array_equal(np.asarray(idx), np.asarray(idx_ref))
    assert int(np.asarray(idx).max()) < CODEBOOK_SIZE and int(np.asarray(idx).min()) >= 0

    # Ragged example: N = 2*19*31 = 1178 (not a multiple of 128) exercises the
    # small tail pad + partial last grid block path.
    z2 = jax.random.normal(jax.random.PRNGKey(1), (2, 19, 31, D), dtype=jnp.float32) * 2.0
    q2, idx2 = fsq_forward(z2)
    jax.block_until_ready((q2, idx2))
    q2_ref, idx2_ref = _fsq_reference(z2)
    np.testing.assert_allclose(np.asarray(q2), np.asarray(q2_ref), rtol=1e-5, atol=1e-5)
    np.testing.assert_array_equal(np.asarray(idx2), np.asarray(idx2_ref))

    print("KERNEL_OK")
</pallas_src>

<mosaic_0001>
module attributes {stable_mosaic.version = 11 : i64} {
  func.func @_fsq_kernel(%arg0: i32, %arg1: memref<4x640xf32, #tpu.memory_space<vmem>>, %arg2: memref<8x640xf32, #tpu.memory_space<vmem>>, %arg3: memref<640x256xbf16, #tpu.memory_space<vmem>>, %arg4: memref<4x640xf32, #tpu.memory_space<vmem>>, %arg5: memref<4x128xi32, #tpu.memory_space<vmem>>) attributes {dimension_semantics = [#tpu.dimension_semantics<parallel>], iteration_bounds = array<i64: 1>, scalar_prefetch = 0 : i64, scratch_operands = 0 : i64, tpu.core_type = #tpu.core_type<tc>, window_params = [{transform_indices = @transform_0, window_bounds = array<i64: 4, 640>}, {pipeline_mode = #tpu.pipeline_mode<synchronous>, transform_indices = @transform_1, window_bounds = array<i64: 8, 640>}, {pipeline_mode = #tpu.pipeline_mode<synchronous>, transform_indices = @transform_2, window_bounds = array<i64: 640, 256>}, {transform_indices = @transform_3, window_bounds = array<i64: 4, 640>}, {transform_indices = @transform_4, window_bounds = array<i64: 4, 128>}]} {
    %c0 = arith.constant 0 : index
    %c0_0 = arith.constant 0 : index
    %0 = vector.load %arg1[%c0, %c0_0] : memref<4x640xf32, #tpu.memory_space<vmem>>, vector<4x640xf32>
    %c0_1 = arith.constant 0 : index
    %c0_2 = arith.constant 0 : index
    %1 = vector.load %arg2[%c0_1, %c0_2] : memref<8x640xf32, #tpu.memory_space<vmem>>, vector<1x640xf32>
    %c1 = arith.constant 1 : index
    %c0_3 = arith.constant 0 : index
    %2 = vector.load %arg2[%c1, %c0_3] : memref<8x640xf32, #tpu.memory_space<vmem>>, vector<1x640xf32>
    %c2 = arith.constant 2 : index
    %c0_4 = arith.constant 0 : index
    %3 = vector.load %arg2[%c2, %c0_4] : memref<8x640xf32, #tpu.memory_space<vmem>>, vector<1x640xf32>
    %c3 = arith.constant 3 : index
    %c0_5 = arith.constant 0 : index
    %4 = vector.load %arg2[%c3, %c0_5] : memref<8x640xf32, #tpu.memory_space<vmem>>, vector<1x640xf32>
    %5 = vector.broadcast %1 : vector<1x640xf32> to vector<4x640xf32>
    %6 = arith.addf %0, %5 : vector<4x640xf32>
    %7 = math.tanh %6 : vector<4x640xf32>
    %8 = vector.broadcast %2 : vector<1x640xf32> to vector<4x640xf32>
    %9 = arith.mulf %7, %8 : vector<4x640xf32>
    %10 = vector.broadcast %3 : vector<1x640xf32> to vector<4x640xf32>
    %11 = arith.subf %9, %10 : vector<4x640xf32>
    %12 = math.roundeven %11 : vector<4x640xf32>
    %13 = vector.broadcast %4 : vector<1x640xf32> to vector<4x640xf32>
    %14 = arith.mulf %12, %13 : vector<4x640xf32>
    %c0_6 = arith.constant 0 : index
    %c0_7 = arith.constant 0 : index
    %15 = vector.load %arg4[%c0_6, %c0_7] : memref<4x640xf32, #tpu.memory_space<vmem>>, vector<4x640xf32>
    tpu.vector_store %arg4[%c0_6, %c0_7], %14 {strides = array<i32>} : memref<4x640xf32, #tpu.memory_space<vmem>>, vector<4x640xf32>,
    %16 = arith.truncf %12 : vector<4x640xf32> to vector<4x640xbf16>
    %c0_8 = arith.constant 0 : index
    %c0_9 = arith.constant 0 : index
    %17 = vector.load %arg3[%c0_8, %c0_9] : memref<640x256xbf16, #tpu.memory_space<vmem>>, vector<640x256xbf16>
    %cst = arith.constant dense<0.000000e+00> : vector<4x256xf32>
    %18 = tpu.matmul %16, %17, %cst {dimension_numbers = #tpu.dot_dimension_numbers<[1], [0], [0], [1], [0, 0, 1, 1], [], []>} : vector<4x640xbf16>, vector<640x256xbf16>, vector<4x256xf32> -> vector<4x256xf32>
    %19 = vector.extract_strided_slice %18 {offsets = [0, 0], sizes = [4, 128], strides = [1, 1]} : vector<4x256xf32> to vector<4x128xf32>
    %20 = vector.extract_strided_slice %18 {offsets = [0, 128], sizes = [4, 128], strides = [1, 1]} : vector<4x256xf32> to vector<4x128xf32>
    %21 = arith.addf %19, %20 : vector<4x128xf32>
    %cst_10 = arith.constant 4.562000e+03 : f32
    %22 = vector.broadcast %cst_10 : f32 to vector<4x128xf32>
    %23 = arith.addf %21, %22 : vector<4x128xf32>
    %cst_11 = arith.constant 5.000000e-01 : f32
    %24 = vector.broadcast %cst_11 : f32 to vector<4x128xf32>
    %25 = arith.addf %23, %24 : vector<4x128xf32>
    %26 = arith.fptosi %25 : vector<4x128xf32> to vector<4x128xi32>
    %c0_12 = arith.constant 0 : index
    %c0_13 = arith.constant 0 : index
    %27 = vector.load %arg5[%c0_12, %c0_13] : memref<4x128xi32, #tpu.memory_space<vmem>>, vector<4x128xi32>
    tpu.vector_store %arg5[%c0_12, %c0_13], %26 {strides = array<i32>} : memref<4x128xi32, #tpu.memory_space<vmem>>, vector<4x128xi32>,
    return
  }
  func.func @transform_0(%arg0: i32) -> (i32, i32) {
    %c0_i32 = arith.constant 0 : i32
    %c0_i32_0 = arith.constant 0 : i32
    return %arg0, %c0_i32 : i32, i32
  }
  func.func @transform_1(%arg0: i32) -> (i32, i32) {
    %c0_i32 = arith.constant 0 : i32
    %c0_i32_0 = arith.constant 0 : i32
    %c0_i32_1 = arith.constant 0 : i32
    return %c0_i32, %c0_i32_0 : i32, i32
  }
  func.func @transform_2(%arg0: i32) -> (i32, i32) {
    %c0_i32 = arith.constant 0 : i32
    %c0_i32_0 = arith.constant 0 : i32
    %c0_i32_1 = arith.constant 0 : i32
    return %c0_i32, %c0_i32_0 : i32, i32
  }
  func.func @transform_3(%arg0: i32) -> (i32, i32) {
    %c0_i32 = arith.constant 0 : i32
    %c0_i32_0 = arith.constant 0 : i32
    return %arg0, %c0_i32 : i32, i32
  }
  func.func @transform_4(%arg0: i32) -> (i32, i32) {
    %c0_i32 = arith.constant 0 : i32
    %c0_i32_0 = arith.constant 0 : i32
    return %arg0, %c0_i32 : i32, i32
  }
}

</mosaic_0001>

<bundles_post_ra>
// kernel: fsq_forward.1
= control target key start
LH: loop header
LB: loop body
LE: loop exit
PB: predicated region body
PF: predicated region fallthrough
CT: control target
= control target key end

     0   :  { %vm43_vm0 = vcmask 1043456   ;;  %s1789_s2 = inlined_call_operand.vmem [shape: bf16[640,256], index: 2, kind: input, shape index: {}]   ;;  %s1790_s1 = inlined_call_operand.vmem [shape: f32[8,640], index: 1, kind: input, shape index: {}]   ;;  %s1791_s0 = inlined_call_operand.vmem [shape: f32[4,640], index: 0, kind: input, shape index: {}]   ;;  %s1792_s3 = inlined_call_operand.vmem [shape: f32[4,640], index: 3, kind: output, shape index: {0}]   ;;  %s1793_s4 = inlined_call_operand.vmem [shape: s32[4,128], index: 4, kind: output, shape index: {1}]  }
   0x1   :  { %v818_v0 = vld [vmem:[%s1789_s2 + $0x70] sm:$0xf]  ;;  %v1095_v1 = vld [vmem:[%s1789_s2 + $0x74] sm:$0xf0]  ;;  %v810_v5 = vld [vmem:[%s1789_s2 + $0x60] sm:$0xf] }
   0x2   :  { %v882_v2 = vld [vmem:[%s1789_s2 + $0xf0] sm:$0xf]  ;;  %v819_v3 = vor.u32 %v1095_v1, %v818_v0  ;;  %v1111_v4 = vld [vmem:[%s1789_s2 + $0xf4] sm:$0xf0]  ;;  %v1093_v6 = vld [vmem:[%s1789_s2 + $0x64] sm:$0xf0] }
   0x3   :  { %v883_v7 = vor.u32 %v1111_v4, %v882_v2  ;;  %v874_v8 = vld [vmem:[%s1789_s2 + $0xe0] sm:$0xf]  ;;  %v1109_v9 = vld [vmem:[%s1789_s2 + $0xe4] sm:$0xf0]  ;;  %v811_v10 = vor.u32 %v1093_v6, %v810_v5  ;;  %v802_v11 = vld [vmem:[%s1789_s2 + $0x50] sm:$0xf] }
   0x4   :  { %611 = vmatpush.bf16.msra.mxu0 %v819_v3  ;;  %v1091_v12 = vld [vmem:[%s1789_s2 + $0x54] sm:$0xf0]  ;;  %v875_v13 = vor.u32 %v1109_v9, %v874_v8  ;;  %v946_v14 = vld [vmem:[%s1789_s2 + $0x170] sm:$0xf]  ;;  %v938_v22 = vld [vmem:[%s1789_s2 + $0x160] sm:$0xf] }
   0x5   :  { %624 = vmatpush.bf16.msra.mxu1 %v883_v7  ;;  %v1127_v15 = vld [vmem:[%s1789_s2 + $0x174] sm:$0xf0]  ;;  %v1010_v16 = vld [vmem:[%s1789_s2 + $0x1f0] sm:$0xf]  ;;  %v803_v23 = vor.u32 %v1091_v12, %v802_v11  ;;  %v1125_v24 = vld [vmem:[%s1789_s2 + $0x164] sm:$0xf0] }
   0x6   :  { %v866_v17 = vld [vmem:[%s1789_s2 + $0xd0] sm:$0xf]  ;;  %v1107_v18 = vld [vmem:[%s1789_s2 + $0xd4] sm:$0xf0]  ;;  %v947_v19 = vor.u32 %v1127_v15, %v946_v14  ;;  %v1002_v25 = vld [vmem:[%s1789_s2 + $0x1e0] sm:$0xf]  ;;  %v939_v31 = vor.u32 %v1125_v24, %v938_v22 }
   0x7   :  { %v1143_v20 = vld [vmem:[%s1789_s2 + $0x1f4] sm:$0xf0]  ;;  %v1141_v26 = vld [vmem:[%s1789_s2 + $0x1e4] sm:$0xf0]  ;;  %v867_v27 = vor.u32 %v1107_v18, %v866_v17  ;;  %v794_v28 = vld [vmem:[%s1789_s2 + $0x40] sm:$0xf] }
   0x8   :  { %v1011_v21 = vor.u32 %v1143_v20, %v1010_v16  ;;  %612 = vmatpush.bf16.msra.mxu0 %v811_v10  ;;  %637 = vmatpush.bf16.msra.mxu2 %v947_v19  ;;  %v1089_v29 = vld [vmem:[%s1789_s2 + $0x44] sm:$0xf0]  ;;  %v858_v30 = vld [vmem:[%s1789_s2 + $0xc0] sm:$0xf]  ;;  %v1003_v32 = vor.u32 %v1141_v26, %v1002_v25  ;;  %v930_v34 = vld [vmem:[%s1789_s2 + $0x150] sm:$0xf] }
   0x9   :  { %625 = vmatpush.bf16.msra.mxu1 %v875_v13  ;;  %v1105_v33 = vld [vmem:[%s1789_s2 + $0xc4] sm:$0xf0]  ;;  %v1123_v35 = vld [vmem:[%s1789_s2 + $0x154] sm:$0xf0]  ;;  %v994_v36 = vld [vmem:[%s1789_s2 + $0x1d0] sm:$0xf]  ;;  %v795_v38 = vor.u32 %v1089_v29, %v794_v28 }
   0xa   :  { %650 = vmatpush.bf16.msra.mxu3 %v1011_v21  ;;  %v1139_v37 = vld [vmem:[%s1789_s2 + $0x1d4] sm:$0xf0]  ;;  %v786_v39 = vld [vmem:[%s1789_s2 + $0x30] sm:$0xf]  ;;  %v931_v41 = vor.u32 %v1123_v35, %v930_v34  ;;  %v859_v42 = vor.u32 %v1105_v33, %v858_v30  ;;  %v922_v45 = vld [vmem:[%s1789_s2 + $0x140] sm:$0xf] }
   0xb   :  { %v1087_v40 = vld [vmem:[%s1789_s2 + $0x34] sm:$0xf0]  ;;  %v850_v43 = vld [vmem:[%s1789_s2 + $0xb0] sm:$0xf]  ;;  %v995_v44 = vor.u32 %v1139_v37, %v994_v36  ;;  %v1121_v46 = vld [vmem:[%s1789_s2 + $0x144] sm:$0xf0] }
   0xc   :  { %613 = vmatpush.bf16.msra.mxu0 %v803_v23  ;;  %638 = vmatpush.bf16.msra.mxu2 %v939_v31  ;;  %v1103_v47 = vld [vmem:[%s1789_s2 + $0xb4] sm:$0xf0]  ;;  %v986_v48 = vld [vmem:[%s1789_s2 + $0x1c0] sm:$0xf]  ;;  %v1137_v49 = vld [vmem:[%s1789_s2 + $0x1c4] sm:$0xf0]  ;;  %v787_v50 = vor.u32 %v1087_v40, %v786_v39  ;;  %v923_v53 = vor.u32 %v1121_v46, %v922_v45 }
   0xd   :  { %626 = vmatpush.bf16.msra.mxu1 %v867_v27  ;;  %v778_v51 = vld [vmem:[%s1789_s2 + $0x20] sm:$0xf]  ;;  %v1085_v52 = vld [vmem:[%s1789_s2 + $0x24] sm:$0xf0]  ;;  %v851_v54 = vor.u32 %v1103_v47, %v850_v43  ;;  %v987_v56 = vor.u32 %v1137_v49, %v986_v48  ;;  %v914_v57 = vld [vmem:[%s1789_s2 + $0x130] sm:$0xf] }
   0xe   :  { %651 = vmatpush.bf16.msra.mxu3 %v1003_v32  ;;  %v842_v55 = vld [vmem:[%s1789_s2 + $0xa0] sm:$0xf]  ;;  %v1119_v58 = vld [vmem:[%s1789_s2 + $0x134] sm:$0xf0]  ;;  %v1101_v59 = vld [vmem:[%s1789_s2 + $0xa4] sm:$0xf0]  ;;  %v779_v62 = vor.u32 %v1085_v52, %v778_v51 }
   0xf   :  { %v978_v60 = vld [vmem:[%s1789_s2 + $0x1b0] sm:$0xf]  ;;  %v1135_v61 = vld [vmem:[%s1789_s2 + $0x1b4] sm:$0xf0]  ;;  %v915_v1 = vor.u32 %v1119_v58, %v914_v57  ;;  %v843_v2 = vor.u32 %v1101_v59, %v842_v55  ;;  %v906_v5 = vld [vmem:[%s1789_s2 + $0x120] sm:$0xf] }
  0x10   :  { %614 = vmatpush.bf16.msra.mxu0 %v795_v38  ;;  %639 = vmatpush.bf16.msra.mxu2 %v931_v41  ;;  %v770_v63 = vld [vmem:[%s1789_s2 + $0x10] sm:$0xf]  ;;  %v1083_v0 = vld [vmem:[%s1789_s2 + $0x14] sm:$0xf0]  ;;  %v979_v4 = vor.u32 %v1135_v61, %v978_v60  ;;  %v1117_v6 = vld [vmem:[%s1789_s2 + $0x124] sm:$0xf0] }
  0x11   :  { %627 = vmatpush.bf16.msra.mxu1 %v859_v42  ;;  %v834_v3 = vld [vmem:[%s1789_s2 + $0x90] sm:$0xf]  ;;  %v1099_v7 = vld [vmem:[%s1789_s2 + $0x94] sm:$0xf0]  ;;  %v970_v8 = vld [vmem:[%s1789_s2 + $0x1a0] sm:$0xf]  ;;  %v771_v10 = vor.u32 %v1083_v0, %v770_v63  ;;  %v907_v14 = vor.u32 %v1117_v6, %v906_v5 }
  0x12   :  { %652 = vmatpush.bf16.msra.mxu3 %v995_v44  ;;  %v1133_v9 = vld [vmem:[%s1789_s2 + $0x1a4] sm:$0xf0]  ;;  %v762_v11 = vld [vmem:[%s1789_s2] sm:$0xf]  ;;  %v835_v15 = vor.u32 %v1099_v7, %v834_v3  ;;  %v898_v18 = vld [vmem:[%s1789_s2 + $0x110] sm:$0xf] }
  0x13   :  { %v1081_v12 = vld [vmem:[%s1789_s2 + $0x4] sm:$0xf0]  ;;  %v826_v13 = vld [vmem:[%s1789_s2 + $0x80] sm:$0xf]  ;;  %v971_v17 = vor.u32 %v1133_v9, %v970_v8  ;;  %v1115_v19 = vld [vmem:[%s1789_s2 + $0x114] sm:$0xf0] }
  0x14   :  { %615 = vmatpush.bf16.msra.mxu0 %v787_v50  ;;  %640 = vmatpush.bf16.msra.mxu2 %v923_v53  ;;  %v1097_v16 = vld [vmem:[%s1789_s2 + $0x84] sm:$0xf0]  ;;  %v1074_v20 = vld [vmem:[%s1789_s2 + $0x270] sm:$0xf]  ;;  %v1159_v21 = vld [vmem:[%s1789_s2 + $0x274] sm:$0xf0]  ;;  %v763_v26 = vor.u32 %v1081_v12, %v762_v11  ;;  %v899_v27 = vor.u32 %v1115_v19, %v898_v18 }
  0x15   :  { %628 = vmatpush.bf16.msra.mxu1 %v851_v54  ;;  %v1094_v22 = vld [vmem:[%s1789_s2 + $0x74] sm:$0xf]  ;;  %v820_v23 = vld [vmem:[%s1789_s2 + $0x78] sm:$0xf0]  ;;  %v962_v24 = vld [vmem:[%s1789_s2 + $0x190] sm:$0xf]  ;;  %v827_v30 = vor.u32 %v1097_v16, %v826_v13  ;;  %v1075_v31 = vor.u32 %v1159_v21, %v1074_v20 }
  0x16   :  { %653 = vmatpush.bf16.msra.mxu3 %v987_v56  ;;  %v1131_v25 = vld [vmem:[%s1789_s2 + $0x194] sm:$0xf0]  ;;  %v1066_v28 = vld [vmem:[%s1789_s2 + $0x260] sm:$0xf]  ;;  %v1157_v29 = vld [vmem:[%s1789_s2 + $0x264] sm:$0xf0]  ;;  %v823_v36 = vor.u32 %v1094_v22, %v820_v23 }
  0x17   :  { %v1092_v32 = vld [vmem:[%s1789_s2 + $0x64] sm:$0xf]  ;;  %v812_v33 = vld [vmem:[%s1789_s2 + $0x68] sm:$0xf0]  ;;  %v890_v34 = vld [vmem:[%s1789_s2 + $0x100] sm:$0xf]  ;;  %v963_v37 = vor.u32 %v1131_v25, %v962_v24  ;;  %v1067_v50 = vor.u32 %v1157_v29, %v1066_v28 }
  0x18   :  { %616 = vmatpush.bf16.msra.mxu0 %v779_v62  ;;  %641 = vmatpush.bf16.msra.mxu2 %v915_v1  ;;  %v1113_v35 = vld [vmem:[%s1789_s2 + $0x104] sm:$0xf0]  ;;  %v1110_v38 = vld [vmem:[%s1789_s2 + $0xf4] sm:$0xf]  ;;  %v884_v39 = vld [vmem:[%s1789_s2 + $0xf8] sm:$0xf0]  ;;  %v815_v55 = vor.u32 %v1092_v32, %v812_v33 }
  0x19   :  { %629 = vmatpush.bf16.msra.mxu1 %v843_v2  ;;  %v954_v40 = vld [vmem:[%s1789_s2 + $0x180] sm:$0xf]  ;;  %v1129_v41 = vld [vmem:[%s1789_s2 + $0x184] sm:$0xf0]  ;;  %v1126_v42 = vld [vmem:[%s1789_s2 + $0x174] sm:$0xf]  ;;  %v891_v44 = vor.u32 %v1113_v35, %v890_v34  ;;  %v887_v52 = vor.u32 %v1110_v38, %v884_v39 }
  0x1a   :  { %654 = vmatpush.bf16.msra.mxu3 %v979_v4  ;;  %v948_v43 = vld [vmem:[%s1789_s2 + $0x178] sm:$0xf0]  ;;  %v1058_v45 = vld [vmem:[%s1789_s2 + $0x250] sm:$0xf]  ;;  %v1155_v46 = vld [vmem:[%s1789_s2 + $0x254] sm:$0xf0]  ;;  %v955_v56 = vor.u32 %v1129_v41, %v954_v40 }
  0x1b   :  { %v1108_v47 = vld [vmem:[%s1789_s2 + $0xe4] sm:$0xf]  ;;  %v876_v48 = vld [vmem:[%s1789_s2 + $0xe8] sm:$0xf0]  ;;  %v1090_v51 = vld [vmem:[%s1789_s2 + $0x54] sm:$0xf]  ;;  %v951_v61 = vor.u32 %v1126_v42, %v948_v43  ;;  %v1059_v7 = vor.u32 %v1155_v46, %v1058_v45 }
  0x1c   :  { %617 = vmatpush.bf16.msra.mxu0 %v771_v10  ;;  %642 = vmatpush.bf16.msra.mxu2 %v907_v14  ;;  %v19_v49 = vld [vmem:[%s1790_s1] ss:$8 sm:$0xf]  ;;  %v754_v54 = vld [vmem:[%s1790_s1 + $0x1] ss:$8 sm:$0xf]  ;;  %v879_v9 = vor.u32 %v1108_v47, %v876_v48 }
  0x1d   :  { %630 = vmatpush.bf16.msra.mxu1 %v835_v15  ;;  %v20_v53 = vld [vmem:[%s1790_s1] ss:$8 sm:$0x10]  ;;  %v755_v58 = vld [vmem:[%s1790_s1 + $0x1] ss:$8 sm:$0x10] }
  0x1e   :  { %655 = vmatpush.bf16.msra.mxu3 %v971_v17  ;;  %v1472_v57 = vor.u32 %v20_v53, %v19_v49  ;;  %v756_v59 = vld [vmem:[%s1790_s1 + $0x2] ss:$8 sm:$0xf]  ;;  %v804_v60 = vld [vmem:[%s1789_s2 + $0x58] sm:$0xf0]  ;;  %v1483_v62 = vor.u32 %v755_v58, %v754_v54 }
  0x1f   :  { %v757_v63 = vld [vmem:[%s1790_s1 + $0x2] ss:$8 sm:$0x10]  ;;  %v1153_v1 = vld [vmem:[%s1789_s2 + $0x244] sm:$0xf0]  ;;  %v807_v13 = vor.u32 %v1090_v51, %v804_v60 }
  0x20   :  { %618 = vmatpush.bf16.msra.mxu0 %v763_v26  ;;  %643 = vmatpush.bf16.msra.mxu2 %v899_v27  ;;  %v1050_v0 = vld [vmem:[%s1789_s2 + $0x240] sm:$0xf]  ;;  %v1124_v2 = vld [vmem:[%s1789_s2 + $0x164] sm:$0xf]  ;;  %v940_v3 = vld [vmem:[%s1789_s2 + $0x168] sm:$0xf0]  ;;  %v1500_v4 = vor.u32 %v757_v63, %v756_v59 }
  0x21   :  { %631 = vmatpush.bf16.msra.mxu1 %v827_v30  ;;  %v35_v5 = vperm.slane %v1472_v57, 0  ;;  %v36_v6 = vperm.slane %v1472_v57, 1  ;;  %v1088_v8 = vld [vmem:[%s1789_s2 + $0x44] sm:$0xf]  ;;  %v1106_v10 = vld [vmem:[%s1789_s2 + $0xd4] sm:$0xf]  ;;  %v943_v19 = vor.u32 %v1124_v2, %v940_v3  ;;  %v1051_v28 = vor.u32 %v1153_v1, %v1050_v0 }
  0x22   :  { %656 = vmatpush.bf16.msra.mxu3 %v963_v37  ;;  %v868_v11 = vld [vmem:[%s1789_s2 + $0xd8] sm:$0xf0]  ;;  %v16_v12 = vld [vmem:[%s1791_s0] sm:$0xff]  ;;  %v37_v16 = vperm.slane %v1472_v57, 2  ;;  %v38_v17 = vperm.slane %v1472_v57, 3  ;;  %v56_v21 = vperm.slane %v1483_v62, 1 }
  0x23   :  { %v758_v14 = vld [vmem:[%s1790_s1 + $0x3] ss:$8 sm:$0xf]  ;;  %v41_v15 = vrot.slane %v36_v6, 4  ;;  %v796_v18 = vld [vmem:[%s1789_s2 + $0x48] sm:$0xf0] }
  0x24   :  { %663 = vmatpush.bf16.msrb.mxu0 %v1075_v31  ;;  %644 = vmatpush.bf16.msra.mxu2 %v891_v44  ;;  %v759_v20 = vld [vmem:[%s1790_s1 + $0x3] ss:$8 sm:$0x10]  ;;  %v1042_v22 = vld [vmem:[%s1789_s2 + $0x230] sm:$0xf]  ;;  %v72_v24 = vperm.slane %v1500_v4, 1  ;;  %v871_v31 = vor.u32 %v1106_v10, %v868_v11  ;;  %v799_v34 = vor.u32 %v1088_v8, %v796_v18 }
  0x25   :  { %676 = vmatpush.bf16.msrb.mxu1 %v823_v36  ;;  %v44_v23 = vsel %vm43_vm0, %v35_v5, %v41_v15  ;;  %v1122_v25 = vld [vmem:[%s1789_s2 + $0x154] sm:$0xf]  ;;  %v932_v26 = vld [vmem:[%s1789_s2 + $0x158] sm:$0xf0]  ;;  %v42_v27 = vrot.slane %v38_v17, 4  ;;  %v17_v33 = vld [vmem:[%s1791_s0 + $0x8] sm:$0xff]  ;;  %v1548_v35 = vor.u32 %v759_v20, %v758_v14 }
  0x26   :  { %657 = vmatpush.bf16.msra.mxu3 %v955_v56  ;;  %v1151_v29 = vld [vmem:[%s1789_s2 + $0x234] sm:$0xf0]  ;;  %v1086_v30 = vld [vmem:[%s1789_s2 + $0x34] sm:$0xf]  ;;  %v48_v32 = vadd.f32 %v44_v23, %v16_v12  ;;  %v55_v36 = vperm.slane %v1483_v62, 0  ;;  %v61_v41 = vrot.slane %v56_v21, 4  ;;  %v935_v43 = vor.u32 %v1122_v25, %v932_v26 }
  0x27   :  { %v1104_v37 = vld [vmem:[%s1789_s2 + $0xc4] sm:$0xf]  ;;  %v860_v38 = vld [vmem:[%s1789_s2 + $0xc8] sm:$0xf0]  ;;  %v45_v39 = vsel %vm43_vm0, %v37_v16, %v42_v27  ;;  %v788_v40 = vld [vmem:[%s1789_s2 + $0x38] sm:$0xf0]  ;;  %v1043_v51 = vor.u32 %v1151_v29, %v1042_v22 }
  0x28   :  { %664 = vmatpush.bf16.msrb.mxu0 %v1067_v50  ;;  %689 = vmatpush.bf16.msrb.mxu2 %v887_v52  ;;  %1189 = vtanh.f32 %v48_v32  ;;  %v71_v42 = vperm.slane %v1500_v4, 0  ;;  %v18_v44 = vld [vmem:[%s1791_s0 + $0x10] sm:$0xf]  ;;  %v77_v45 = vrot.slane %v72_v24, 4  ;;  %v1034_v46 = vld [vmem:[%s1789_s2 + $0x220] sm:$0xf]  ;;  %v49_v49 = vadd.f32 %v45_v39, %v17_v33 }
  0x29   :  { %677 = vmatpush.bf16.msrb.mxu1 %v815_v55  ;;  %v1120_v47 = vld [vmem:[%s1789_s2 + $0x144] sm:$0xf]  ;;  %v924_v48 = vld [vmem:[%s1789_s2 + $0x148] sm:$0xf0]  ;;  %v58_v50 = vperm.slane %v1483_v62, 3  ;;  %v863_v54 = vor.u32 %v1104_v37, %v860_v38  ;;  %v57_v55 = vperm.slane %v1483_v62, 2  ;;  %v791_v58 = vor.u32 %v1086_v30, %v788_v40 }
  0x2a   :  { %702 = vmatpush.bf16.msrb.mxu3 %v951_v61  ;;  %v1149_v52 = vld [vmem:[%s1789_s2 + $0x224] sm:$0xf0]  ;;  %v1084_v53 = vld [vmem:[%s1789_s2 + $0x24] sm:$0xf]  ;;  %v74_v56 = vperm.slane %v1500_v4, 3  ;;  %1191 = vtanh.f32 %v49_v49  ;;  %v39_v63 = vperm.slane %v1472_v57, 4  ;;  %v63_v0 = vsel %vm43_vm0, %v55_v36, %v61_v41 }
  0x2b   :  { %v780_v59 = vld [vmem:[%s1789_s2 + $0x28] sm:$0xf0]  ;;  %v62_v60 = vrot.slane %v58_v50, 4  ;;  %v1102_v61 = vld [vmem:[%s1789_s2 + $0xb4] sm:$0xf]  ;;  %v91_v1 = vperm.slane %v1548_v35, 1  ;;  %v927_v2 = vor.u32 %v1120_v47, %v924_v48  ;;  %v79_v5 = vsel %vm43_vm0, %v71_v42, %v77_v45 }
  0x2c   :  { %665 = vmatpush.bf16.msrb.mxu0 %v1059_v7  ;;  %690 = vmatpush.bf16.msrb.mxu2 %v879_v9  ;;  %v852_v3 = vld [vmem:[%s1789_s2 + $0xb8] sm:$0xf0]  ;;  %v73_v6 = vperm.slane %v1500_v4, 2  ;;  %v78_v7 = vrot.slane %v74_v56, 4  ;;  %v1118_v8 = vld [vmem:[%s1789_s2 + $0x134] sm:$0xf]  ;;  %v50_v9 = vadd.f32 %v39_v63, %v18_v44  ;;  %v1035_v12 = vor.u32 %v1149_v52, %v1034_v46 }
  0x2d   :  { %678 = vmatpush.bf16.msrb.mxu1 %v807_v13  ;;  %v916_v57 = vld [vmem:[%s1789_s2 + $0x138] sm:$0xf0]  ;;  %v90_v11 = vperm.slane %v1548_v35, 0  ;;  %v783_v13 = vor.u32 %v1084_v53, %v780_v59  ;;  %v1026_v14 = vld [vmem:[%s1789_s2 + $0x210] sm:$0xf]  ;;  %v855_v16 = vor.u32 %v1102_v61, %v852_v3  ;;  %v64_v18 = vsel %vm43_vm0, %v57_v55, %v62_v60 }
  0x2e   :  { %703 = vmatpush.bf16.msrb.mxu3 %v943_v19  ;;  %v1190_v10 = vpop.eup %1189  ;;  %v1147_v15 = vld [vmem:[%s1789_s2 + $0x214] sm:$0xf0]  ;;  %v93_v19 = vperm.slane %v1548_v35, 3  ;;  %v1100_v20 = vld [vmem:[%s1789_s2 + $0xa4] sm:$0xf]  ;;  %1193 = vtanh.f32 %v50_v9  ;;  %v96_v22 = vrot.slane %v91_v1, 4  ;;  %v919_v26 = vor.u32 %v1118_v8, %v916_v57 }
  0x2f   :  { %v67_v17 = vmul.f32 %v1190_v10, %v63_v0  ;;  %v844_v21 = vld [vmem:[%s1789_s2 + $0xa8] sm:$0xf0]  ;;  %v92_v23 = vperm.slane %v1548_v35, 2  ;;  %v1082_v24 = vld [vmem:[%s1789_s2 + $0x14] sm:$0xf]  ;;  %v80_v29 = vsel %vm43_vm0, %v73_v6, %v78_v7  ;;  %v59_v48 = vperm.slane %v1483_v62, 4 }
  0x30   :  { %666 = vmatpush.bf16.msrb.mxu0 %v1051_v28  ;;  %691 = vmatpush.bf16.msrb.mxu2 %v871_v31  ;;  %v772_v25 = vld [vmem:[%s1789_s2 + $0x18] sm:$0xf0]  ;;  %v1192_v27 = vpop.eup %1191  ;;  %v1018_v30 = vld [vmem:[%s1789_s2 + $0x200] sm:$0xf]  ;;  %v1116_v31 = vld [vmem:[%s1789_s2 + $0x124] sm:$0xf]  ;;  %v847_v37 = vor.u32 %v1100_v20, %v844_v21  ;;  %v98_v7 = vsel %vm43_vm0, %v90_v11, %v96_v22 }
  0x31   :  { %679 = vmatpush.bf16.msrb.mxu1 %v799_v34  ;;  %v83_v28 = vsub.f32 %v67_v17, %v79_v5  ;;  %v908_v32 = vld [vmem:[%s1789_s2 + $0x128] sm:$0xf0]  ;;  %v68_v33 = vmul.f32 %v1192_v27, %v64_v18  ;;  %v1027_v34 = vor.u32 %v1147_v15, %v1026_v14  ;;  %v1145_v36 = vld [vmem:[%s1789_s2 + $0x204] sm:$0xf0]  ;;  %v1098_v38 = vld [vmem:[%s1789_s2 + $0x94] sm:$0xf] }
  0x32   :  { %704 = vmatpush.bf16.msrb.mxu3 %v935_v43  ;;  %v836_v39 = vld [vmem:[%s1789_s2 + $0x98] sm:$0xf0]  ;;  %v97_v42 = vrot.slane %v93_v19, 4  ;;  %v775_v43 = vor.u32 %v1082_v24, %v772_v25  ;;  %v1080_v45 = vld [vmem:[%s1789_s2 + $0x4] sm:$0xf]  ;;  %v911_v47 = vor.u32 %v1116_v31, %v908_v32  ;;  %v75_v49 = vperm.slane %v1500_v4, 4 }
  0x33   :  { %v1160_v40 = vand.u32 2147483647, %v83_v28  ;;  %v1162_v41 = vcvt.f32.s32 %v83_v28  ;;  %v84_v44 = vsub.f32 %v68_v33, %v80_v29  ;;  %v764_v46 = vld [vmem:[%s1789_s2 + $0x8] sm:$0xf0]  ;;  %v1165_v52 = vand.u32 2147483648, %v83_v28 }
  0x34   :  { %667 = vmatpush.bf16.msrb.mxu0 %v1043_v51  ;;  %692 = vmatpush.bf16.msrb.mxu2 %v863_v54  ;;  %v1194_v50 = vpop.eup %1193  ;;  %v1019_v53 = vor.u32 %v1145_v36, %v1018_v30  ;;  %v839_v54 = vor.u32 %v1098_v38, %v836_v39  ;;  %v1114_v55 = vld [vmem:[%s1789_s2 + $0x114] sm:$0xf]  ;;  %v900_v56 = vld [vmem:[%s1789_s2 + $0x118] sm:$0xf0]  ;;  %v767_v61 = vor.u32 %v1080_v45, %v764_v46  ;;  %v1096_v63 = vld [vmem:[%s1789_s2 + $0x84] sm:$0xf] }
  0x35   :  { %680 = vmatpush.bf16.msrb.mxu1 %v791_v58  ;;  %v1163_v51 = vcvt.s32.f32 %v1162_v41  ;;  %vm1658_vm1 = vcmp.lt.f32.partialorder %v1160_v40, 8388608.0  ;;  %v1168_v62 = vand.u32 2147483647, %v84_v44  ;;  %v1170_v59 = vcvt.f32.s32 %v84_v44  ;;  %v828_v0 = vld [vmem:[%s1789_s2 + $0x88] sm:$0xf0] }
  0x36   :  { %705 = vmatpush.bf16.msrb.mxu3 %v927_v2  ;;  %v69_v4 = vmul.f32 %v1194_v50, %v59_v48  ;;  %v1173_v2 = vand.u32 2147483648, %v84_v44  ;;  %v903_v5 = vor.u32 %v1114_v55, %v900_v56  ;;  %v1112_v8 = vld [vmem:[%s1789_s2 + $0x104] sm:$0xf]  ;;  %v892_v57 = vld [vmem:[%s1789_s2 + $0x108] sm:$0xf0]  ;;  %v99_v10 = vsel %vm43_vm0, %v92_v23, %v97_v42 }
  0x37   :  { %v1164_v60 = vand.u32 2147483647, %v1163_v51  ;;  %v1171_v1 = vcvt.s32.f32 %v1170_v59  ;;  %vm1169_vm2 = vcmp.lt.f32.partialorder %v1168_v62, 8388608.0  ;;  %v895_v19 = vor.u32 %v1112_v8, %v892_v57  ;;  %v1142_v23 = vld [vmem:[%s1789_s2 + $0x1f4] sm:$0xf] }
  0x38   :  { %668 = vmatpush.bf16.msrb.mxu0 %v1035_v12  ;;  %693 = vmatpush.bf16.msrb.mxu2 %v855_v16  ;;  %v85_v3 = vsub.f32 %v69_v4, %v75_v49  ;;  %v94_v24 = vperm.slane %v1548_v35, 4  ;;  %v1012_v25 = vld [vmem:[%s1789_s2 + $0x1f8] sm:$0xf0]  ;;  %v1140_v35 = vld [vmem:[%s1789_s2 + $0x1e4] sm:$0xf] }
  0x39   :  { %681 = vmatpush.bf16.msrb.mxu1 %v783_v13  ;;  %v1166_v6 = vor.u32 %v1165_v52, %v1164_v60  ;;  %v1172_v9 = vand.u32 2147483647, %v1171_v1  ;;  %v831_v13 = vor.u32 %v1096_v63, %v828_v0  ;;  %v1076_v27 = vld [vmem:[%s1789_s2 + $0x278] sm:$0xf0]  ;;  %v1004_v29 = vld [vmem:[%s1789_s2 + $0x1e8] sm:$0xf0]  ;;  %v1015_v33 = vor.u32 %v1142_v23, %v1012_v25 }
  0x3a   :  { %706 = vmatpush.bf16.msrb.mxu3 %v919_v26  ;;  %v1178_v12 = vcvt.f32.s32 %v85_v3  ;;  %v1176_v11 = vand.u32 2147483647, %v85_v3  ;;  %v1181_v15 = vand.u32 2147483648, %v85_v3  ;;  %v1158_v26 = vld [vmem:[%s1789_s2 + $0x274] sm:$0xf] }
  0x3b   :  { %v1167_v14 = vsel %vm1658_vm1, %v1166_v6, %v83_v28  ;;  %v1174_v17 = vor.u32 %v1173_v2, %v1172_v9  ;;  %v1156_v39 = vld [vmem:[%s1789_s2 + $0x264] sm:$0xf]  ;;  %v1068_v40 = vld [vmem:[%s1789_s2 + $0x268] sm:$0xf0]  ;;  %v996_v48 = vld [vmem:[%s1789_s2 + $0x1d8] sm:$0xf0] }
  0x3c   :  { %669 = vmatpush.bf16.msrb.mxu0 %v1027_v34  ;;  %694 = vmatpush.bf16.msrb.mxu2 %v847_v37  ;;  %v102_v16 = vmul.f32 %v1167_v14, %v98_v7  ;;  %111 = vst [vmem:[#allocation1] ss:$2 sm:$0xff] %v1167_v14  ;;  %v1179_v18 = vcvt.s32.f32 %v1178_v12  ;;  %vm1177_vm3 = vcmp.lt.f32.partialorder %v1176_v11, 8388608.0  ;;  %v1079_v34 = vor.u32 %v1158_v26, %v1076_v27  ;;  %v1154_v49 = vld [vmem:[%s1789_s2 + $0x254] sm:$0xf] }
  0x3d   :  { %682 = vmatpush.bf16.msrb.mxu1 %v775_v43  ;;  %v1175_v20 = vsel %vm1169_vm2, %v1174_v17, %v84_v44  ;;  %v1007_v43 = vor.u32 %v1140_v35, %v1004_v29  ;;  %v1071_v46 = vor.u32 %v1156_v39, %v1068_v40  ;;  %v1060_v50 = vld [vmem:[%s1789_s2 + $0x258] sm:$0xf0]  ;;  %v1152_v55 = vld [vmem:[%s1789_s2 + $0x244] sm:$0xf]  ;;  %v1052_v56 = vld [vmem:[%s1789_s2 + $0x248] sm:$0xf0] }
  0x3e   :  { %707 = vmatpush.bf16.msrb.mxu3 %v911_v47  ;;  %105 = vst [vmem:[%s1792_s3] sm:$0xff] %v102_v16  ;;  %v1180_v21 = vand.u32 2147483647, %v1179_v18  ;;  %v103_v22 = vmul.f32 %v1175_v20, %v99_v10  ;;  %v1138_v47 = vld [vmem:[%s1789_s2 + $0x1d4] sm:$0xf]  ;;  %v1063_v52 = vor.u32 %v1154_v49, %v1060_v50  ;;  %v1055_v59 = vor.u32 %v1152_v55, %v1052_v56  ;;  %v980_v60 = vld [vmem:[%s1789_s2 + $0x1b8] sm:$0xf0] }
  0x3f   :  { %113 = vst [vmem:[#allocation1 + $0x10] ss:$2 sm:$0xff] %v1175_v20  ;;  %v999_v51 = vor.u32 %v1138_v47, %v996_v48  ;;  %v1134_v4 = vld [vmem:[%s1789_s2 + $0x1b4] sm:$0xf]  ;;  %v1044_v63 = vld [vmem:[%s1789_s2 + $0x238] sm:$0xf0] }
  0x40   :  { %670 = vmatpush.bf16.msrb.mxu0 %v1019_v53  ;;  %695 = vmatpush.bf16.msrb.mxu2 %v839_v54  ;;  %v1182_v28 = vor.u32 %v1181_v15, %v1180_v21  ;;  %106 = vst [vmem:[%s1792_s3 + $0x8] sm:$0xff] %v103_v22  ;;  %v1136_v53 = vld [vmem:[%s1789_s2 + $0x1c4] sm:$0xf]  ;;  %v988_v54 = vld [vmem:[%s1789_s2 + $0x1c8] sm:$0xf0]  ;;  %v983_v1 = vor.u32 %v1134_v4, %v980_v60 }
  0x41   :  { %683 = vmatpush.bf16.msrb.mxu1 %v767_v61  ;;  %v991_v62 = vor.u32 %v1136_v53, %v988_v54  ;;  %v1150_v61 = vld [vmem:[%s1789_s2 + $0x234] sm:$0xf]  ;;  %v1148_v6 = vld [vmem:[%s1789_s2 + $0x224] sm:$0xf]  ;;  %v1036_v7 = vld [vmem:[%s1789_s2 + $0x228] sm:$0xf0] }
  0x42   :  { %708 = vmatpush.bf16.msrb.mxu3 %v903_v5  ;;  %v1183_v30 = vsel %vm1177_vm3, %v1182_v28, %v85_v3  ;;  %v1047_v2 = vor.u32 %v1150_v61, %v1044_v63  ;;  %v1132_v3 = vld [vmem:[%s1789_s2 + $0x1a4] sm:$0xf]  ;;  %v972_v5 = vld [vmem:[%s1789_s2 + $0x1a8] sm:$0xf0]  ;;  %v1039_v57 = vor.u32 %v1148_v6, %v1036_v7  ;;  %v1130_v9 = vld [vmem:[%s1789_s2 + $0x194] sm:$0xf] }
  0x43   :  { %v116_v31 = vld.sshfl [vmem:[#allocation1] sm:$0xff pattern:$0x75316420]  ;;  %v117_v32 = vld.sshfl [vmem:[#allocation1 + $0x8] sm:$0xff pattern:$0x75316420]  ;;  %v104_v36 = vmul.f32 %v1183_v30, %v94_v24  ;;  %v975_v8 = vor.u32 %v1132_v3, %v972_v5 }
  0x44   :  { %696 = vmatpush.bf16.msrb.mxu2 %v831_v13  ;;  %v126_v37 = vpack.c.bf16 %v116_v31, %v116_v31  ;;  %v127_v38 = vpack.c.bf16 %v117_v32, %v117_v32  ;;  %115 = vst [vmem:[#allocation1 + $0x20] ss:$2 sm:$0xff] %v1183_v30  ;;  %v964_v10 = vld [vmem:[%s1789_s2 + $0x198] sm:$0xf0]  ;;  %v1146_v12 = vld [vmem:[%s1789_s2 + $0x214] sm:$0xf] }
  0x45   :  { %107 = vst [vmem:[%s1792_s3 + $0x10] sm:$0xf] %v104_v36  ;;  %v1028_v13 = vld [vmem:[%s1789_s2 + $0x218] sm:$0xf0]  ;;  %v967_v14 = vor.u32 %v1130_v9, %v964_v10  ;;  %v1128_v15 = vld [vmem:[%s1789_s2 + $0x184] sm:$0xf] }
  0x46   :  { %709 = vmatpush.bf16.msrb.mxu3 %v895_v19  ;;  %619 = vmatmul.bf16.vlgmr.msra.gmra.mxu0 %v126_v37  ;;  %v118_v41 = vld.sshfl [vmem:[#allocation1 + $0x10] sm:$0xff pattern:$0x75316420]  ;;  %v119_v42 = vld.sshfl [vmem:[#allocation1 + $0x18] sm:$0xff pattern:$0x75316420]  ;;  %v1031_v11 = vor.u32 %v1146_v12, %v1028_v13 }
  0x47   :  { %632 = vmatmul.bf16.vlgmr.msra.gmra.mxu1 %v127_v38  ;;  %v128_v44 = vpack.c.bf16 %v118_v41, %v118_v41  ;;  %v129_v45 = vpack.c.bf16 %v119_v42, %v119_v42  ;;  %715 = vmatpush.bf16.msra.mxu0 %v1015_v33  ;;  %v956_v16 = vld [vmem:[%s1789_s2 + $0x188] sm:$0xf0]  ;;  %v1144_v17 = vld [vmem:[%s1789_s2 + $0x204] sm:$0xf] }
  0x48   :  { %728 = vmatpush.bf16.msra.mxu1 %v1079_v34  ;;  %v1020_v18 = vld [vmem:[%s1789_s2 + $0x208] sm:$0xf0]  ;;  %v959_v19 = vor.u32 %v1128_v15, %v956_v16 }
  0x49   :  { %645 = vmatmul.bf16.vlgmr.msra.gmra.mxu2 %v128_v44  ;;  %658 = vmatmul.bf16.vlgmr.msra.gmra.mxu3 %v129_v45  ;;  %v1023_v20 = vor.u32 %v1144_v17, %v1020_v18 }
  0x4b   :  { %716 = vmatpush.bf16.msra.mxu0 %v1007_v43  ;;  %v120_v58 = vld.sshfl [vmem:[#allocation1 + $0x20] sm:$0xff pattern:$0x75316420] }
  0x4c   :  { %729 = vmatpush.bf16.msra.mxu1 %v1071_v46  ;;  %v130_v0 = vpack.c.bf16 %v120_v58, %v120_v58 }
  0x4f   :  { %717 = vmatpush.bf16.msra.mxu0 %v999_v51 }
  0x50   :  { %730 = vmatpush.bf16.msra.mxu1 %v1063_v52 }
  0x53   :  { %718 = vmatpush.bf16.msra.mxu0 %v991_v62 }
  0x54   :  { %731 = vmatpush.bf16.msra.mxu1 %v1055_v59 }
  0x56   :  { %671 = vmatmul.bf16.vlgmr.msrb.gmra.mxu0 %v130_v0 }
  0x57   :  { %684 = vmatmul.bf16.vlgmr.msrb.gmra.mxu1 %v126_v37  ;;  %719 = vmatpush.bf16.msra.mxu0 %v983_v1 }
  0x58   :  { %732 = vmatpush.bf16.msra.mxu1 %v1047_v2 }
  0x59   :  { %697 = vmatmul.bf16.vlgmr.msrb.gmra.mxu2 %v127_v38  ;;  %710 = vmatmul.bf16.vlgmr.msrb.gmra.mxu3 %v128_v44 }
  0x5b   :  { %720 = vmatpush.bf16.msra.mxu0 %v975_v8 }
  0x5c   :  { %733 = vmatpush.bf16.msra.mxu1 %v1039_v57 }
  0x5f   :  { %721 = vmatpush.bf16.msra.mxu0 %v967_v14 }
  0x60   :  { %734 = vmatpush.bf16.msra.mxu1 %v1031_v11 }
  0x63   :  { %722 = vmatpush.bf16.msra.mxu0 %v959_v19 }
  0x64   :  { %735 = vmatpush.bf16.msra.mxu1 %v1023_v20 }
  0x66   :  { %723 = vmatmul.bf16.vlgmr.msra.gmra.mxu0 %v129_v45 }
  0x67   :  { %736 = vmatmul.bf16.vlgmr.msra.gmra.mxu1 %v130_v0 }
  0xc3   :  { %v620_v21 = vpop.f32.mrf.mxu0 }
  0xc4   :  { %v633_v22 = vpop.f32.mrf.mxu1 }
  0xc5   :  { %v634_v30 = vadd.f32 %v633_v22, %v620_v21 }
  0xcb   :  { %v622_v23 = vpop.f32.mrf.mxu0 }
  0xcc   :  { %v635_v24 = vpop.f32.mrf.mxu1  ;;  %v646_v25 = vpop.f32.mrf.mxu2 }
  0xcd   :  { %v659_v26 = vpop.f32.mrf.mxu3  ;;  %v647_v36 = vadd.f32 %v646_v25, %v634_v30 }
  0xcf   :  { %v660_v38 = vadd.f32 %v659_v26, %v647_v36 }
  0xd3   :  { %v672_v27 = vpop.f32.mrf.mxu0 }
  0xd4   :  { %v685_v28 = vpop.f32.mrf.mxu1  ;;  %v648_v35 = vpop.f32.mrf.mxu2  ;;  %v673_v45 = vadd.f32 %v672_v27, %v660_v38 }
  0xd5   :  { %v661_v29 = vpop.f32.mrf.mxu3 }
  0xdb   :  { %v674_v31 = vpop.f32.mrf.mxu0 }
  0xdc   :  { %v687_v32 = vpop.f32.mrf.mxu1  ;;  %v698_v33 = vpop.f32.mrf.mxu2 }
  0xdd   :  { %v711_v34 = vpop.f32.mrf.mxu3  ;;  %v699_v37 = vadd.f32 %v698_v33, %v685_v28 }
  0xdf   :  { %v712_v39 = vadd.f32 %v711_v34, %v699_v37 }
  0xe3   :  { %v724_v40 = vpop.f32.mrf.mxu0 }
  0xe4   :  { %v737_v41 = vpop.f32.mrf.mxu1  ;;  %v700_v42 = vpop.f32.mrf.mxu2  ;;  %v725_v44 = vadd.f32 %v724_v40, %v712_v39 }
  0xe5   :  { %v713_v43 = vpop.f32.mrf.mxu3 }
  0xe6   :  { %v738_v46 = vadd.f32 %v737_v41, %v725_v44 }
  0xe8   :  { %v741_v47 = vadd.f32 %v738_v46, %v673_v45 }
  0xea   :  { %v742_v48 = vadd.f32 4562.0, %v741_v47 }
  0xeb   :  { %v726_v49 = vpop.f32.mrf.mxu0 }
  0xec   :  { %v739_v50 = vpop.f32.mrf.mxu1  ;;  %v743_v51 = vadd.f32 0.5, %v742_v48 }
  0xee   :  { %vm1184_vm4 = vcmp.lt.s32.totalorder %v743_v51, 0  ;;  %v1185_v52 = vceil.f32 %v743_v51  ;;  %v1186_v53 = vfloor.f32 %v743_v51 }
  0xf0   :  { %v1187_v54 = vsel %vm1184_vm4, %v1185_v52, %v1186_v53 }
  0xf1   :  { %v1188_v55 = vcvt.f32.s32 %v1187_v54 }
  0xf3   :  { %745 = vst [vmem:[%s1793_s4] sm:$0xf] %v1188_v55 }

</bundles_post_ra>
